<compile_context>
chip_gen: v5e
topology: v5e:2x2
jax: 0.10.0
libtpu: 0.0.40
codegen_flags: <defaults>
</compile_context>

<pallas_src>
import functools
import math

import jax
import jax.numpy as jnp
from jax.experimental import pallas as pl
from jax.experimental.pallas import tpu as pltpu

_LANE = 128
_WIDE = 256   # v6e/v7x MXU width; only pad to this when the natural dim already reaches it


def _round_up(x, m):
    return ((x + m - 1) // m) * m


def _pad_dim(d):
    return _round_up(d, _WIDE) if d >= _WIDE else _round_up(d, _LANE)


def _batch_tiling(batch):
    """Pick (tile, padded_batch). Tile is a multiple of 16 (bf16 sublane packing),
    at most 512; once batch >= 256 it is capped so the grid has >= 2 steps so both
    v7x TensorCores get work under the "parallel" grid axis."""
    b16 = _round_up(max(batch, 1), 16)
    if b16 < 2 * _LANE:
        tb = b16                              # single tile; splitting further wastes steps
    else:
        tb = min(512, 16 * (b16 // 32))       # guarantees padded_batch // tb >= 2
    pbatch = _round_up(batch, tb)
    return tb, pbatch


def _goal_decoder_kernel(n_linear, x_ref, *refs):
    """x_ref: (TB, in_pad) bf16.  refs = (W0, b0, ..., W_{n-1}, b_{n-1}, out_ref)."""
    out_ref = refs[-1]
    param_refs = refs[:-1]
    assert len(param_refs) == 2 * n_linear

    h = x_ref[...]                                  # bf16 activations feed the MXU
    for li in range(n_linear):
        w = param_refs[2 * li][...]                 # bf16 [fan_in_pad, fan_out_pad]
        b = param_refs[2 * li + 1][...]             # f32  [1, fan_out_pad]
        acc = jnp.dot(h, w, preferred_element_type=jnp.float32) + b   # f32 accumulate
        if li < n_linear - 1:
            h = jnp.maximum(acc, 0.0).astype(jnp.bfloat16)   # ReLU in f32, bf16 to next MXU
        else:
            h = acc                                          # goal_head: no activation
    out_ref[...] = h.astype(out_ref.dtype)


def prepare_goal_decoder_params(params):
    """Pad + bf16-cast all (W, b) once (hoisted out of the per-call forward path).
    params: list of (W [fan_in, fan_out] f32, b [1, fan_out] f32).
    Returns (padded_params_tuple, out_dim)."""
    dims = [params[0][0].shape[0]] + [w.shape[1] for w, _ in params]
    pdims = [_pad_dim(d) for d in dims]
    padded = []
    for li, (w, b) in enumerate(params):
        fi, fo = w.shape
        pfi, pfo = pdims[li], pdims[li + 1]
        w_p = jnp.zeros((pfi, pfo), jnp.bfloat16).at[:fi, :fo].set(w.astype(jnp.bfloat16))
        b_p = jnp.zeros((1, pfo), jnp.float32).at[:, :fo].set(
            b.reshape(1, -1).astype(jnp.float32))
        padded.append((w_p, b_p))
    return tuple(padded), dims[-1]


def _forward_impl(x, padded_params, *, out_dim, out_dtype, single_buffer_weights):
    n_linear = len(padded_params)
    batch, in_dim = x.shape
    pdims = [padded_params[0][0].shape[0]] + [w.shape[1] for w, _ in padded_params]

    tb, pbatch = _batch_tiling(batch)
    x_p = (jnp.zeros((pbatch, pdims[0]), jnp.bfloat16)
           .at[:batch, :in_dim].set(x.astype(jnp.bfloat16)))

    grid = (pbatch // tb,)

    # Weights/biases are grid-invariant (index_map -> (0,0)): single-buffer them.
    weight_mode = {"pipeline_mode": pl.Buffered(1)} if single_buffer_weights else {}

    flat_args = [x_p]
    in_specs = [pl.BlockSpec((tb, pdims[0]), lambda i: (i, 0))]
    for w_p, b_p in padded_params:
        flat_args += [w_p, b_p]
        in_specs.append(pl.BlockSpec(w_p.shape, lambda i: (0, 0), **weight_mode))
        in_specs.append(pl.BlockSpec(b_p.shape, lambda i: (0, 0), **weight_mode))
    out_spec = pl.BlockSpec((tb, pdims[-1]), lambda i: (i, 0))

    # ---- VMEM budget: single-buffered weights + double-buffered x / out tiles ----
    out_itemsize = jnp.dtype(out_dtype).itemsize
    weight_bytes = sum(w.size * w.dtype.itemsize + b.size * b.dtype.itemsize
                       for w, b in padded_params)
    if not single_buffer_weights:
        weight_bytes *= 2
    io_bytes = 2 * tb * (pdims[0] * 2 + pdims[-1] * out_itemsize)
    scratch_bytes = 2 * tb * max(pdims) * 4          # f32 intermediate-activation headroom
    vmem_limit = int(min(max(weight_bytes + io_bytes + scratch_bytes + (8 << 20), 32 << 20),
                         56 << 20))                  # <= 56 MiB: headroom on v7x's 64 MiB

    kernel = functools.partial(_goal_decoder_kernel, n_linear)
    out_p = pl.pallas_call(
        kernel,
        out_shape=jax.ShapeDtypeStruct((pbatch, pdims[-1]), out_dtype),
        grid=grid,
        in_specs=in_specs,
        out_specs=out_spec,
        compiler_params=pltpu.CompilerParams(
            dimension_semantics=("parallel",),       # batch tiles shard across v7x's 2 TCs
            vmem_limit_bytes=vmem_limit,
        ),
    )(*flat_args)
    return out_p[:batch, :out_dim]


_forward_jit = jax.jit(
    _forward_impl,
    static_argnames=("out_dim", "out_dtype", "single_buffer_weights"),
)


def goal_decoder_forward(x, prepared, out_dtype=jnp.bfloat16):
    """x: [B, in_dim] f32. prepared = prepare_goal_decoder_params(params)."""
    padded_params, out_dim = prepared
    try:
        return _forward_jit(x, padded_params, out_dim=out_dim, out_dtype=out_dtype,
                            single_buffer_weights=True)
    except Exception:
        # Fallback if this JAX build rejects pl.Buffered(1) on the resident weight specs.
        return _forward_jit(x, padded_params, out_dim=out_dim, out_dtype=out_dtype,
                            single_buffer_weights=False)


def init_goal_decoder_params(key, in_dim, out_dim, hidden_layers):
    """PyTorch nn.Linear-style init. Layer order matches GoalDecoder.forward:
    in_fc, hidden_layers[0..n-2], goal_head."""
    dims = [in_dim] + list(hidden_layers) + [out_dim]
    params = []
    for fan_in, fan_out in zip(dims[:-1], dims[1:]):
        key, kw, kb = jax.random.split(key, 3)
        bound = 1.0 / math.sqrt(fan_in)
        w = jax.random.uniform(kw, (fan_in, fan_out), jnp.float32, -bound, bound)
        b = jax.random.uniform(kb, (1, fan_out), jnp.float32, -bound, bound)
        params.append((w, b))
    return params


def goal_decoder_reference(x, params, *, bf16_matmul=True):
    """Plain-JAX reference of GoalDecoder.forward (optionally mimicking bf16 MXU inputs)."""
    h = x
    n = len(params)
    for li, (w, b) in enumerate(params):
        if bf16_matmul:
            h = jnp.dot(h.astype(jnp.bfloat16), w.astype(jnp.bfloat16),
                        preferred_element_type=jnp.float32) + b
        else:
            h = h @ w + b
        if li < n - 1:
            h = jnp.maximum(h, 0.0)
    return h


if __name__ == "__main__":
    # Small shapes consistent with GoalDecoder(in_dim, out_dim, hidden_layers).
    batch = 256           # >= 2 grid steps (TB=128) => both v7x TensorCores get a tile
    in_dim = 32
    hidden_layers = [64, 64]
    out_dim = 16

    key = jax.random.PRNGKey(0)
    key, kx = jax.random.split(key)
    x = jax.random.normal(kx, (batch, in_dim), jnp.float32)

    params = init_goal_decoder_params(key, in_dim, out_dim, hidden_layers)
    prepared = prepare_goal_decoder_params(params)   # pad + bf16-cast ONCE, outside forward

    out = goal_decoder_forward(x, prepared)          # bf16 output (halved padded writeback)
    out = jax.block_until_ready(out)
    assert out.shape == (batch, out_dim)
    out_f32 = out.astype(jnp.float32)

    # Tight check vs a reference using the same bf16 matmul inputs / f32 accumulation
    # (only delta is the final bf16 output rounding).
    ref_bf16 = goal_decoder_reference(x, params, bf16_matmul=True)
    assert jnp.allclose(out_f32, ref_bf16, atol=1e-2, rtol=1e-2), "mismatch vs bf16 reference"

    # Loose sanity check vs the exact f32 reference.
    ref_f32 = goal_decoder_reference(x, params, bf16_matmul=False)
    assert jnp.allclose(out_f32, ref_f32, atol=5e-2, rtol=5e-2), "mismatch vs f32 reference"

    print("KERNEL_OK")
</pallas_src>

<mosaic_0001>
module attributes {stable_mosaic.version = 11 : i64} {
  func.func @_goal_decoder_kernel(%arg0: i32, %arg1: memref<128x128xbf16, #tpu.memory_space<vmem>>, %arg2: memref<128x128xbf16, #tpu.memory_space<vmem>>, %arg3: memref<1x128xf32, #tpu.memory_space<vmem>>, %arg4: memref<128x128xbf16, #tpu.memory_space<vmem>>, %arg5: memref<1x128xf32, #tpu.memory_space<vmem>>, %arg6: memref<128x128xbf16, #tpu.memory_space<vmem>>, %arg7: memref<1x128xf32, #tpu.memory_space<vmem>>, %arg8: memref<128x128xbf16, #tpu.memory_space<vmem>>) attributes {dimension_semantics = [#tpu.dimension_semantics<parallel>], iteration_bounds = array<i64: 2>, scalar_prefetch = 0 : i64, scratch_operands = 0 : i64, tpu.core_type = #tpu.core_type<tc>, window_params = [{transform_indices = @transform_0, window_bounds = array<i64: 128, 128>}, {pipeline_mode = #tpu.pipeline_mode<synchronous>, transform_indices = @transform_1, window_bounds = array<i64: 128, 128>}, {pipeline_mode = #tpu.pipeline_mode<synchronous>, transform_indices = @transform_2, window_bounds = array<i64: 1, 128>}, {pipeline_mode = #tpu.pipeline_mode<synchronous>, transform_indices = @transform_3, window_bounds = array<i64: 128, 128>}, {pipeline_mode = #tpu.pipeline_mode<synchronous>, transform_indices = @transform_4, window_bounds = array<i64: 1, 128>}, {pipeline_mode = #tpu.pipeline_mode<synchronous>, transform_indices = @transform_5, window_bounds = array<i64: 128, 128>}, {pipeline_mode = #tpu.pipeline_mode<synchronous>, transform_indices = @transform_6, window_bounds = array<i64: 1, 128>}, {transform_indices = @transform_7, window_bounds = array<i64: 128, 128>}]} {
    %c0 = arith.constant 0 : index
    %c0_0 = arith.constant 0 : index
    %0 = vector.load %arg1[%c0, %c0_0] : memref<128x128xbf16, #tpu.memory_space<vmem>>, vector<128x128xbf16>
    %c0_1 = arith.constant 0 : index
    %c0_2 = arith.constant 0 : index
    %1 = vector.load %arg2[%c0_1, %c0_2] : memref<128x128xbf16, #tpu.memory_space<vmem>>, vector<128x128xbf16>
    %c0_3 = arith.constant 0 : index
    %c0_4 = arith.constant 0 : index
    %2 = vector.load %arg3[%c0_3, %c0_4] : memref<1x128xf32, #tpu.memory_space<vmem>>, vector<1x128xf32>
    %cst = arith.constant dense<0.000000e+00> : vector<128x128xf32>
    %3 = tpu.matmul %0, %1, %cst {dimension_numbers = #tpu.dot_dimension_numbers<[1], [0], [0], [1], [0, 0, 1, 1], [], []>} : vector<128x128xbf16>, vector<128x128xbf16>, vector<128x128xf32> -> vector<128x128xf32>
    %4 = vector.broadcast %2 : vector<1x128xf32> to vector<128x128xf32>
    %5 = arith.addf %3, %4 : vector<128x128xf32>
    %cst_5 = arith.constant 0.000000e+00 : f32
    %6 = vector.broadcast %cst_5 : f32 to vector<128x128xf32>
    %7 = arith.maximumf %5, %6 : vector<128x128xf32>
    %8 = arith.truncf %7 : vector<128x128xf32> to vector<128x128xbf16>
    %c0_6 = arith.constant 0 : index
    %c0_7 = arith.constant 0 : index
    %9 = vector.load %arg4[%c0_6, %c0_7] : memref<128x128xbf16, #tpu.memory_space<vmem>>, vector<128x128xbf16>
    %c0_8 = arith.constant 0 : index
    %c0_9 = arith.constant 0 : index
    %10 = vector.load %arg5[%c0_8, %c0_9] : memref<1x128xf32, #tpu.memory_space<vmem>>, vector<1x128xf32>
    %cst_10 = arith.constant dense<0.000000e+00> : vector<128x128xf32>
    %11 = tpu.matmul %8, %9, %cst_10 {dimension_numbers = #tpu.dot_dimension_numbers<[1], [0], [0], [1], [0, 0, 1, 1], [], []>} : vector<128x128xbf16>, vector<128x128xbf16>, vector<128x128xf32> -> vector<128x128xf32>
    %12 = vector.broadcast %10 : vector<1x128xf32> to vector<128x128xf32>
    %13 = arith.addf %11, %12 : vector<128x128xf32>
    %cst_11 = arith.constant 0.000000e+00 : f32
    %14 = vector.broadcast %cst_11 : f32 to vector<128x128xf32>
    %15 = arith.maximumf %13, %14 : vector<128x128xf32>
    %16 = arith.truncf %15 : vector<128x128xf32> to vector<128x128xbf16>
    %c0_12 = arith.constant 0 : index
    %c0_13 = arith.constant 0 : index
    %17 = vector.load %arg6[%c0_12, %c0_13] : memref<128x128xbf16, #tpu.memory_space<vmem>>, vector<128x128xbf16>
    %c0_14 = arith.constant 0 : index
    %c0_15 = arith.constant 0 : index
    %18 = vector.load %arg7[%c0_14, %c0_15] : memref<1x128xf32, #tpu.memory_space<vmem>>, vector<1x128xf32>
    %cst_16 = arith.constant dense<0.000000e+00> : vector<128x128xf32>
    %19 = tpu.matmul %16, %17, %cst_16 {dimension_numbers = #tpu.dot_dimension_numbers<[1], [0], [0], [1], [0, 0, 1, 1], [], []>} : vector<128x128xbf16>, vector<128x128xbf16>, vector<128x128xf32> -> vector<128x128xf32>
    %20 = vector.broadcast %18 : vector<1x128xf32> to vector<128x128xf32>
    %21 = arith.addf %19, %20 : vector<128x128xf32>
    %22 = arith.truncf %21 : vector<128x128xf32> to vector<128x128xbf16>
    %c0_17 = arith.constant 0 : index
    %c0_18 = arith.constant 0 : index
    %23 = vector.load %arg8[%c0_17, %c0_18] : memref<128x128xbf16, #tpu.memory_space<vmem>>, vector<128x128xbf16>
    tpu.vector_store %arg8[%c0_17, %c0_18], %22 {strides = array<i32>} : memref<128x128xbf16, #tpu.memory_space<vmem>>, vector<128x128xbf16>,
    return
  }
  func.func @transform_0(%arg0: i32) -> (i32, i32) {
    %c0_i32 = arith.constant 0 : i32
    %c0_i32_0 = arith.constant 0 : i32
    return %arg0, %c0_i32 : i32, i32
  }
  func.func @transform_1(%arg0: i32) -> (i32, i32) {
    %c0_i32 = arith.constant 0 : i32
    %c0_i32_0 = arith.constant 0 : i32
    %c0_i32_1 = arith.constant 0 : i32
    return %c0_i32, %c0_i32_0 : i32, i32
  }
  func.func @transform_2(%arg0: i32) -> (i32, i32) {
    %c0_i32 = arith.constant 0 : i32
    %c0_i32_0 = arith.constant 0 : i32
    %c0_i32_1 = arith.constant 0 : i32
    return %c0_i32, %c0_i32_0 : i32, i32
  }
  func.func @transform_3(%arg0: i32) -> (i32, i32) {
    %c0_i32 = arith.constant 0 : i32
    %c0_i32_0 = arith.constant 0 : i32
    %c0_i32_1 = arith.constant 0 : i32
    return %c0_i32, %c0_i32_0 : i32, i32
  }
  func.func @transform_4(%arg0: i32) -> (i32, i32) {
    %c0_i32 = arith.constant 0 : i32
    %c0_i32_0 = arith.constant 0 : i32
    %c0_i32_1 = arith.constant 0 : i32
    return %c0_i32, %c0_i32_0 : i32, i32
  }
  func.func @transform_5(%arg0: i32) -> (i32, i32) {
    %c0_i32 = arith.constant 0 : i32
    %c0_i32_0 = arith.constant 0 : i32
    %c0_i32_1 = arith.constant 0 : i32
    return %c0_i32, %c0_i32_0 : i32, i32
  }
  func.func @transform_6(%arg0: i32) -> (i32, i32) {
    %c0_i32 = arith.constant 0 : i32
    %c0_i32_0 = arith.constant 0 : i32
    %c0_i32_1 = arith.constant 0 : i32
    return %c0_i32, %c0_i32_0 : i32, i32
  }
  func.func @transform_7(%arg0: i32) -> (i32, i32) {
    %c0_i32 = arith.constant 0 : i32
    %c0_i32_0 = arith.constant 0 : i32
    return %arg0, %c0_i32 : i32, i32
  }
}

module attributes {stable_mosaic.version = 11 : i64} {
  func.func @_goal_decoder_kernel(%arg0: i32, %arg1: memref<128x128xbf16, #tpu.memory_space<vmem>>, %arg2: memref<128x128xbf16, #tpu.memory_space<vmem>>, %arg3: memref<1x128xf32, #tpu.memory_space<vmem>>, %arg4: memref<128x128xbf16, #tpu.memory_space<vmem>>, %arg5: memref<1x128xf32, #tpu.memory_space<vmem>>, %arg6: memref<128x128xbf16, #tpu.memory_space<vmem>>, %arg7: memref<1x128xf32, #tpu.memory_space<vmem>>, %arg8: memref<128x128xbf16, #tpu.memory_space<vmem>>) attributes {dimension_semantics = [#tpu.dimension_semantics<parallel>], iteration_bounds = array<i64: 2>, scalar_prefetch = 0 : i64, scratch_operands = 0 : i64, tpu.core_type = #tpu.core_type<tc>, window_params = [{transform_indices = @transform_0, window_bounds = array<i64: 128, 128>}, {pipeline_mode = #tpu.pipeline_mode<synchronous>, transform_indices = @transform_1, window_bounds = array<i64: 128, 128>}, {pipeline_mode = #tpu.pipeline_mode<synchronous>, transform_indices = @transform_2, window_bounds = array<i64: 1, 128>}, {pipeline_mode = #tpu.pipeline_mode<synchronous>, transform_indices = @transform_3, window_bounds = array<i64: 128, 128>}, {pipeline_mode = #tpu.pipeline_mode<synchronous>, transform_indices = @transform_4, window_bounds = array<i64: 1, 128>}, {pipeline_mode = #tpu.pipeline_mode<synchronous>, transform_indices = @transform_5, window_bounds = array<i64: 128, 128>}, {pipeline_mode = #tpu.pipeline_mode<synchronous>, transform_indices = @transform_6, window_bounds = array<i64: 1, 128>}, {transform_indices = @transform_7, window_bounds = array<i64: 128, 128>}]} {
    %c0 = arith.constant 0 : index
    %c0_0 = arith.constant 0 : index
    %0 = vector.load %arg1[%c0, %c0_0] : memref<128x128xbf16, #tpu.memory_space<vmem>>, vector<128x128xbf16>
    %c0_1 = arith.constant 0 : index
    %c0_2 = arith.constant 0 : index
    %1 = vector.load %arg2[%c0_1, %c0_2] : memref<128x128xbf16, #tpu.memory_space<vmem>>, vector<128x128xbf16>
    %c0_3 = arith.constant 0 : index
    %c0_4 = arith.constant 0 : index
    %2 = vector.load %arg3[%c0_3, %c0_4] : memref<1x128xf32, #tpu.memory_space<vmem>>, vector<1x128xf32>
    %cst = arith.constant dense<0.000000e+00> : vector<128x128xf32>
    %3 = tpu.matmul %0, %1, %cst {dimension_numbers = #tpu.dot_dimension_numbers<[1], [0], [0], [1], [0, 0, 1, 1], [], []>} : vector<128x128xbf16>, vector<128x128xbf16>, vector<128x128xf32> -> vector<128x128xf32>
    %4 = vector.broadcast %2 : vector<1x128xf32> to vector<128x128xf32>
    %5 = arith.addf %3, %4 : vector<128x128xf32>
    %cst_5 = arith.constant 0.000000e+00 : f32
    %6 = vector.broadcast %cst_5 : f32 to vector<128x128xf32>
    %7 = arith.maximumf %5, %6 : vector<128x128xf32>
    %8 = arith.truncf %7 : vector<128x128xf32> to vector<128x128xbf16>
    %c0_6 = arith.constant 0 : index
    %c0_7 = arith.constant 0 : index
    %9 = vector.load %arg4[%c0_6, %c0_7] : memref<128x128xbf16, #tpu.memory_space<vmem>>, vector<128x128xbf16>
    %c0_8 = arith.constant 0 : index
    %c0_9 = arith.constant 0 : index
    %10 = vector.load %arg5[%c0_8, %c0_9] : memref<1x128xf32, #tpu.memory_space<vmem>>, vector<1x128xf32>
    %cst_10 = arith.constant dense<0.000000e+00> : vector<128x128xf32>
    %11 = tpu.matmul %8, %9, %cst_10 {dimension_numbers = #tpu.dot_dimension_numbers<[1], [0], [0], [1], [0, 0, 1, 1], [], []>} : vector<128x128xbf16>, vector<128x128xbf16>, vector<128x128xf32> -> vector<128x128xf32>
    %12 = vector.broadcast %10 : vector<1x128xf32> to vector<128x128xf32>
    %13 = arith.addf %11, %12 : vector<128x128xf32>
    %cst_11 = arith.constant 0.000000e+00 : f32
    %14 = vector.broadcast %cst_11 : f32 to vector<128x128xf32>
    %15 = arith.maximumf %13, %14 : vector<128x128xf32>
    %16 = arith.truncf %15 : vector<128x128xf32> to vector<128x128xbf16>
    %c0_12 = arith.constant 0 : index
    %c0_13 = arith.constant 0 : index
    %17 = vector.load %arg6[%c0_12, %c0_13] : memref<128x128xbf16, #tpu.memory_space<vmem>>, vector<128x128xbf16>
    %c0_14 = arith.constant 0 : index
    %c0_15 = arith.constant 0 : index
    %18 = vector.load %arg7[%c0_14, %c0_15] : memref<1x128xf32, #tpu.memory_space<vmem>>, vector<1x128xf32>
    %cst_16 = arith.constant dense<0.000000e+00> : vector<128x128xf32>
    %19 = tpu.matmul %16, %17, %cst_16 {dimension_numbers = #tpu.dot_dimension_numbers<[1], [0], [0], [1], [0, 0, 1, 1], [], []>} : vector<128x128xbf16>, vector<128x128xbf16>, vector<128x128xf32> -> vector<128x128xf32>
    %20 = vector.broadcast %18 : vector<1x128xf32> to vector<128x128xf32>
    %21 = arith.addf %19, %20 : vector<128x128xf32>
    %22 = arith.truncf %21 : vector<128x128xf32> to vector<128x128xbf16>
    %c0_17 = arith.constant 0 : index
    %c0_18 = arith.constant 0 : index
    %23 = vector.load %arg8[%c0_17, %c0_18] : memref<128x128xbf16, #tpu.memory_space<vmem>>, vector<128x128xbf16>
    tpu.vector_store %arg8[%c0_17, %c0_18], %22 {strides = array<i32>} : memref<128x128xbf16, #tpu.memory_space<vmem>>, vector<128x128xbf16>,
    return
  }
  func.func @transform_0(%arg0: i32) -> (i32, i32) {
    %c0_i32 = arith.constant 0 : i32
    %c0_i32_0 = arith.constant 0 : i32
    return %arg0, %c0_i32 : i32, i32
  }
  func.func @transform_1(%arg0: i32) -> (i32, i32) {
    %c0_i32 = arith.constant 0 : i32
    %c0_i32_0 = arith.constant 0 : i32
    %c0_i32_1 = arith.constant 0 : i32
    return %c0_i32, %c0_i32_0 : i32, i32
  }
  func.func @transform_2(%arg0: i32) -> (i32, i32) {
    %c0_i32 = arith.constant 0 : i32
    %c0_i32_0 = arith.constant 0 : i32
    %c0_i32_1 = arith.constant 0 : i32
    return %c0_i32, %c0_i32_0 : i32, i32
  }
  func.func @transform_3(%arg0: i32) -> (i32, i32) {
    %c0_i32 = arith.constant 0 : i32
    %c0_i32_0 = arith.constant 0 : i32
    %c0_i32_1 = arith.constant 0 : i32
    return %c0_i32, %c0_i32_0 : i32, i32
  }
  func.func @transform_4(%arg0: i32) -> (i32, i32) {
    %c0_i32 = arith.constant 0 : i32
    %c0_i32_0 = arith.constant 0 : i32
    %c0_i32_1 = arith.constant 0 : i32
    return %c0_i32, %c0_i32_0 : i32, i32
  }
  func.func @transform_5(%arg0: i32) -> (i32, i32) {
    %c0_i32 = arith.constant 0 : i32
    %c0_i32_0 = arith.constant 0 : i32
    %c0_i32_1 = arith.constant 0 : i32
    return %c0_i32, %c0_i32_0 : i32, i32
  }
  func.func @transform_6(%arg0: i32) -> (i32, i32) {
    %c0_i32 = arith.constant 0 : i32
    %c0_i32_0 = arith.constant 0 : i32
    %c0_i32_1 = arith.constant 0 : i32
    return %c0_i32, %c0_i32_0 : i32, i32
  }
  func.func @transform_7(%arg0: i32) -> (i32, i32) {
    %c0_i32 = arith.constant 0 : i32
    %c0_i32_0 = arith.constant 0 : i32
    return %arg0, %c0_i32 : i32, i32
  }
}

</mosaic_0001>

<bundles_post_ra>
// kernel: _forward_impl.1
= control target key start
LH: loop header
LB: loop body
LE: loop exit
PB: predicated region body
PF: predicated region fallthrough
CT: control target
= control target key end

     0   :  { %s1134_s24 = smov 0   ;;  %s1267_s0 = inlined_call_operand.vmem [shape: bf16[256,128], index: 0, kind: input, shape index: {}]   ;;  %s1268_s1 = inlined_call_operand.vmem [shape: bf16[128,128], index: 1, kind: input, shape index: {}]   ;;  %s1269_s2 = inlined_call_operand.vmem [shape: f32[1,128], index: 2, kind: input, shape index: {}]   ;;  %s1270_s3 = inlined_call_operand.vmem [shape: bf16[128,128], index: 3, kind: input, shape index: {}]   ;;  %s1271_s4 = inlined_call_operand.vmem [shape: f32[1,128], index: 4, kind: input, shape index: {}]   ;;  %s1272_s5 = inlined_call_operand.vmem [shape: bf16[128,128], index: 5, kind: input, shape index: {}]   ;;  %s1273_s6 = inlined_call_operand.vmem [shape: f32[1,128], index: 6, kind: input, shape index: {}]   ;;  %s1274_s7 = inlined_call_operand.vmem [shape: bf16[256,128], index: 7, kind: output, shape index: {}]  }
   0x1 LB: > { %s833_s25 = sadd.s32 4294967295, %s1092_s24   ;;  %p837_p0 = scmp.ge.s32.totalorder %s1092_s24, 1  ;;  %s1092_s24 = sphi %s1134_s24, %s17_s24  }
   0x2   : > { %p238_p1 = scmp.lt.s32.totalorder %s1092_s24, 3 }
   0x4   : > { %p239_p2 = pnand %p837_p0, %p238_p1 }
   0x5   : > { %s838_s11 = sshll.u32 (!%p239_p2), %s833_s25, 4 }
   0x6   : > { %242 = sbr.rel (%p239_p2) target bundleno = 548 (0x224), region = 48  ;;  %p271_p3 = scmp.lt.s32.totalorder (!%p239_p2), %s838_s11, 31 }
   0xb   : > { %v987_v0 = vld [vmem:[%s1268_s1 + $0x38] sm:$0xff]  ;;  %v986_v1 = vld [vmem:[%s1268_s1 + $0x30] sm:$0xff]  ;;  %v985_v2 = vld [vmem:[%s1268_s1 + $0x28] sm:$0xff]  ;;  %s1276_s11 = smov (!%p271_p3, %s838_s11), 31 }
   0xc   : > { %414 = vmatpush.bf16.msra.mxu0 %v987_v0  ;;  %1051 = vmatpush.bf16.msra.mxu3 %v987_v0  ;;  %v984_v3 = vld [vmem:[%s1268_s1 + $0x20] sm:$0xff]  ;;  %v983_v4 = vld [vmem:[%s1268_s1 + $0x18] sm:$0xff]  ;;  %v982_v5 = vld [vmem:[%s1268_s1 + $0x10] sm:$0xff]  ;;  %s839_s18 = sshll.u32 %s1276_s11, 2 }
   0xd   : > { %v981_v6 = vld [vmem:[%s1268_s1 + $0x8] sm:$0xff]  ;;  %v980_v7 = vld [vmem:[%s1268_s1] sm:$0xff]  ;;  %s274_s23 = scalar_lea.vmem %s1267_s0, %s839_s18  ;;  %v995_v14 = vld [vmem:[%s1270_s3 + $0x38] sm:$0xff]  ;;  %s1254_s25 = scalar_lea.vmem %s1274_s7, %s839_s18 }
   0xe   : > { %v972_v8 = vld [vmem:[%s274_s23] sm:$0xff]  ;;  %v978_v9 = vld [vmem:[%s274_s23 + $0x30] sm:$0xff]  ;;  %v973_v10 = vld [vmem:[%s274_s23 + $0x8] sm:$0xff]  ;;  %555 = vmatpush.bf16.msra.mxu1 %v995_v14 }
   0xf   : > { %v979_v11 = vld [vmem:[%s274_s23 + $0x38] sm:$0xff]  ;;  %v974_v12 = vld [vmem:[%s274_s23 + $0x10] sm:$0xff]  ;;  %v993_v16 = vld [vmem:[%s1270_s3 + $0x28] sm:$0xff] }
  0x10   : > { %415 = vmatpush.bf16.msra.mxu0 %v986_v1  ;;  %1052 = vmatpush.bf16.msra.mxu3 %v986_v1  ;;  %v975_v13 = vld [vmem:[%s274_s23 + $0x18] sm:$0xff]  ;;  %v994_v15 = vld [vmem:[%s1270_s3 + $0x30] sm:$0xff]  ;;  %v992_v17 = vld [vmem:[%s1270_s3 + $0x20] sm:$0xff] }
  0x11   : > { %v976_v18 = vld [vmem:[%s274_s23 + $0x20] sm:$0xff]  ;;  %v977_v19 = vld [vmem:[%s274_s23 + $0x28] sm:$0xff]  ;;  %v991_v20 = vld [vmem:[%s1270_s3 + $0x18] sm:$0xff] }
  0x12   : > { %556 = vmatpush.bf16.msra.mxu1 %v994_v15  ;;  %v990_v21 = vld [vmem:[%s1270_s3 + $0x10] sm:$0xff]  ;;  %v989_v22 = vld [vmem:[%s1270_s3 + $0x8] sm:$0xff]  ;;  %v988_v23 = vld [vmem:[%s1270_s3] sm:$0xff] }
  0x13   : > { %v1201_v25 = vld [vmem:[%s1269_s2] ss:$0 sm:$0xff] }
  0x14   : > { %416 = vmatpush.bf16.msra.mxu0 %v985_v2  ;;  %1053 = vmatpush.bf16.msra.mxu3 %v985_v2 }
  0x16   : > { %557 = vmatpush.bf16.msra.mxu1 %v993_v16 }
  0x18   : > { %417 = vmatpush.bf16.msra.mxu0 %v984_v3  ;;  %1054 = vmatpush.bf16.msra.mxu3 %v984_v3  ;;  %v1003_v3 = vld [vmem:[%s1272_s5 + $0x38] sm:$0xff] }
  0x19   : > { %696 = vmatpush.bf16.msra.mxu2 %v1003_v3 }
  0x1a   : > { %558 = vmatpush.bf16.msra.mxu1 %v992_v17 }
  0x1c   : > { %418 = vmatpush.bf16.msra.mxu0 %v983_v4  ;;  %1055 = vmatpush.bf16.msra.mxu3 %v983_v4 }
  0x1e   : > { %559 = vmatpush.bf16.msra.mxu1 %v991_v20 }
  0x20   : > { %419 = vmatpush.bf16.msra.mxu0 %v982_v5  ;;  %1056 = vmatpush.bf16.msra.mxu3 %v982_v5  ;;  %v1002_v5 = vld [vmem:[%s1272_s5 + $0x30] sm:$0xff] }
  0x21   : > { %697 = vmatpush.bf16.msra.mxu2 %v1002_v5 }
  0x22   : > { %560 = vmatpush.bf16.msra.mxu1 %v990_v21 }
  0x24   : > { %420 = vmatpush.bf16.msra.mxu0 %v981_v6  ;;  %1057 = vmatpush.bf16.msra.mxu3 %v981_v6  ;;  %v1001_v6 = vld [vmem:[%s1272_s5 + $0x28] sm:$0xff] }
  0x25   : > { %698 = vmatpush.bf16.msra.mxu2 %v1001_v6 }
  0x26   : > { %561 = vmatpush.bf16.msra.mxu1 %v989_v22 }
  0x28   : > { %421 = vmatpush.bf16.msra.mxu0 %v980_v7  ;;  %1058 = vmatpush.bf16.msra.mxu3 %v980_v7 }
  0x2a   : > { %562 = vmatpush.bf16.msra.mxu1 %v988_v23 }
  0x2b   : > { %422 = vmatmul.bf16.vlgmr.msra.gmra.mxu0 %v972_v8  ;;  %452 = vmatmul.bf16.vlgmr.msra.gmra.mxu3 %v978_v9 }
  0x2c   : > { %1059 = vmatpush.bf16.msrb.mxu3 %v995_v14 }
  0x30   : > { %1060 = vmatpush.bf16.msrb.mxu3 %v994_v15 }
  0x34   : > { %1061 = vmatpush.bf16.msrb.mxu3 %v993_v16 }
  0x38   : > { %1062 = vmatpush.bf16.msrb.mxu3 %v992_v17 }
  0x3b   : > { %427 = vmatmul.bf16.gmra.mxu0 %v973_v10  ;;  %457 = vmatmul.bf16.gmra.mxu3 %v979_v11  ;;  %v1000_v10 = vld [vmem:[%s1272_s5 + $0x20] sm:$0xff] }
  0x3c   : > { %1063 = vmatpush.bf16.msrb.mxu3 %v991_v20  ;;  %699 = vmatpush.bf16.msra.mxu2 %v1000_v10 }
  0x40   : > { %1064 = vmatpush.bf16.msrb.mxu3 %v990_v21  ;;  %v999_v21 = vld [vmem:[%s1272_s5 + $0x18] sm:$0xff] }
  0x41   : > { %700 = vmatpush.bf16.msra.mxu2 %v999_v21 }
  0x44   : > { %1065 = vmatpush.bf16.msrb.mxu3 %v989_v22  ;;  %v998_v22 = vld [vmem:[%s1272_s5 + $0x10] sm:$0xff] }
  0x45   : > { %701 = vmatpush.bf16.msra.mxu2 %v998_v22 }
  0x48   : > { %1066 = vmatpush.bf16.msrb.mxu3 %v988_v23  ;;  %v997_v23 = vld [vmem:[%s1272_s5 + $0x8] sm:$0xff] }
  0x49   : > { %702 = vmatpush.bf16.msra.mxu2 %v997_v23 }
  0x4b   : > { %432 = vmatmul.bf16.gmra.mxu0 %v974_v12 }
  0x4c   : > { %1067 = vmatpush.bf16.msra.mxu3 %v1003_v3 }
  0x50   : > { %1068 = vmatpush.bf16.msra.mxu3 %v1002_v5 }
  0x54   : > { %1069 = vmatpush.bf16.msra.mxu3 %v1001_v6 }
  0x58   : > { %1070 = vmatpush.bf16.msra.mxu3 %v1000_v10 }
  0x5b   : > { %437 = vmatmul.bf16.gmra.mxu0 %v975_v13 }
  0x5c   : > { %1071 = vmatpush.bf16.msra.mxu3 %v999_v21 }
  0x60   : > { %1072 = vmatpush.bf16.msra.mxu3 %v998_v22 }
  0x64   : > { %1073 = vmatpush.bf16.msra.mxu3 %v997_v23 }
  0x6b   : > { %442 = vmatmul.bf16.gmra.mxu0 %v976_v18 }
  0x7b   : > { %447 = vmatmul.bf16.gmra.mxu0 %v977_v19 }
  0xa8   : > { %v423_v24 = vpop.f32.mrf.mxu0 }
  0xa9   : > { %v424_v27 = vadd.f32 %v1201_v25, %v423_v24  ;;  %v996_v24 = vld [vmem:[%s1272_s5] sm:$0xff] }
  0xaa   : > { %703 = vmatpush.bf16.msra.mxu2 %v996_v24  ;;  %1074 = vmatpush.bf16.msra.mxu3 %v996_v24 }
  0xab   : > { %v463_v30 = vmax.f32 %v424_v27, 0.0 }
  0xae   : > { %v453_v26 = vpop.f32.mrf.mxu3 }
  0xaf   : > { %v454_v32 = vadd.f32 %v1201_v25, %v453_v26  ;;  %v1084_v26 = vld [vmem:[%s1271_s4] ss:$0 sm:$0xff] }
  0xb0   : > { %v425_v28 = vpop.f32.mrf.mxu0 }
  0xb1   : > { %v426_v29 = vadd.f32 %v1201_v25, %v425_v28  ;;  %v475_v35 = vmax.f32 %v454_v32, 0.0 }
  0xb3   : > { %v464_v31 = vmax.f32 %v426_v29, 0.0 }
  0xb5   : > { %v479_v33 = vpack.c.bf16 %v464_v31, %v463_v30 }
  0xb6   : > { %v455_v34 = vpop.f32.mrf.mxu3 }
  0xb7   : > { %563 = vmatmul.bf16.vlgmr.msra.gmra.mxu1 %v479_v33  ;;  %v456_v36 = vadd.f32 %v1201_v25, %v455_v34 }
  0xb8   : > { %v428_v37 = vpop.f32.mrf.mxu0 }
  0xb9   : > { %v476_v38 = vmax.f32 %v456_v36, 0.0  ;;  %v429_v41 = vadd.f32 %v1201_v25, %v428_v37 }
  0xbb   : > { %v485_v39 = vpack.c.bf16 %v476_v38, %v475_v35  ;;  %v465_v44 = vmax.f32 %v429_v41, 0.0 }
  0xbd   : > { %593 = vmatmul.bf16.vlgmr.msrb.gmra.mxu3 %v485_v39 }
  0xbe   : > { %v458_v40 = vpop.f32.mrf.mxu3 }
  0xbf   : > { %v459_v46 = vadd.f32 %v1201_v25, %v458_v40 }
  0xc0   : > { %v430_v42 = vpop.f32.mrf.mxu0 }
  0xc1   : > { %v431_v43 = vadd.f32 %v1201_v25, %v430_v42  ;;  %v477_v49 = vmax.f32 %v459_v46, 0.0 }
  0xc3   : > { %v466_v45 = vmax.f32 %v431_v43, 0.0 }
  0xc5   : > { %v480_v47 = vpack.c.bf16 %v466_v45, %v465_v44 }
  0xc6   : > { %v460_v48 = vpop.f32.mrf.mxu3 }
  0xc7   : > { %568 = vmatmul.bf16.gmra.mxu1 %v480_v47  ;;  %v461_v50 = vadd.f32 %v1201_v25, %v460_v48 }
  0xc8   : > { %v433_v51 = vpop.f32.mrf.mxu0 }
  0xc9   : > { %v478_v52 = vmax.f32 %v461_v50, 0.0  ;;  %v434_v54 = vadd.f32 %v1201_v25, %v433_v51 }
  0xcb   : > { %v486_v53 = vpack.c.bf16 %v478_v52, %v477_v49  ;;  %v467_v57 = vmax.f32 %v434_v54, 0.0 }
  0xcd   : > { %598 = vmatmul.bf16.gmra.mxu3 %v486_v53 }
  0xd0   : > { %v435_v55 = vpop.f32.mrf.mxu0 }
  0xd1   : > { %v436_v56 = vadd.f32 %v1201_v25, %v435_v55 }
  0xd3   : > { %v468_v58 = vmax.f32 %v436_v56, 0.0 }
  0xd5   : > { %v481_v59 = vpack.c.bf16 %v468_v58, %v467_v57 }
  0xd7   : > { %573 = vmatmul.bf16.gmra.mxu1 %v481_v59 }
  0xd8   : > { %v438_v60 = vpop.f32.mrf.mxu0 }
  0xd9   : > { %v439_v61 = vadd.f32 %v1201_v25, %v438_v60 }
  0xdb   : > { %v469_v0 = vmax.f32 %v439_v61, 0.0 }
  0xe0   : > { %v440_v62 = vpop.f32.mrf.mxu0 }
  0xe1   : > { %v441_v63 = vadd.f32 %v1201_v25, %v440_v62 }
  0xe3   : > { %v470_v1 = vmax.f32 %v441_v63, 0.0 }
  0xe5   : > { %v482_v2 = vpack.c.bf16 %v470_v1, %v469_v0 }
  0xe7   : > { %578 = vmatmul.bf16.gmra.mxu1 %v482_v2 }
  0xe8   : > { %v443_v4 = vpop.f32.mrf.mxu0 }
  0xe9   : > { %v444_v7 = vadd.f32 %v1201_v25, %v443_v4 }
  0xeb   : > { %v471_v11 = vmax.f32 %v444_v7, 0.0 }
  0xf0   : > { %v445_v8 = vpop.f32.mrf.mxu0 }
  0xf1   : > { %v446_v9 = vadd.f32 %v1201_v25, %v445_v8 }
  0xf3   : > { %v472_v12 = vmax.f32 %v446_v9, 0.0 }
  0xf5   : > { %v483_v13 = vpack.c.bf16 %v472_v12, %v471_v11 }
  0xf7   : > { %583 = vmatmul.bf16.gmra.mxu1 %v483_v13 }
  0xf8   : > { %v448_v14 = vpop.f32.mrf.mxu0 }
  0xf9   : > { %v449_v15 = vadd.f32 %v1201_v25, %v448_v14 }
  0xfb   : > { %v473_v18 = vmax.f32 %v449_v15, 0.0 }
 0x100   : > { %v450_v16 = vpop.f32.mrf.mxu0 }
 0x101   : > { %v451_v17 = vadd.f32 %v1201_v25, %v450_v16 }
 0x103   : > { %v474_v19 = vmax.f32 %v451_v17, 0.0 }
 0x105   : > { %v484_v20 = vpack.c.bf16 %v474_v19, %v473_v18  ;;  %v1085_v19 = vld [vmem:[%s1273_s6] ss:$0 sm:$0xff] }
 0x107   : > { %588 = vmatmul.bf16.gmra.mxu1 %v484_v20 }
 0x134   : > { %v564_v25 = vpop.f32.mrf.mxu1 }
 0x135   : > { %v565_v27 = vadd.f32 %v1084_v26, %v564_v25 }
 0x137   : > { %v604_v30 = vmax.f32 %v565_v27, 0.0 }
 0x13c   : > { %v566_v28 = vpop.f32.mrf.mxu1 }
 0x13d   : > { %v567_v29 = vadd.f32 %v1084_v26, %v566_v28 }
 0x13f   : > { %v605_v31 = vmax.f32 %v567_v29, 0.0 }
 0x140   : > { %v594_v32 = vpop.f32.mrf.mxu3 }
 0x141   : > { %v620_v33 = vpack.c.bf16 %v605_v31, %v604_v30  ;;  %v595_v35 = vadd.f32 %v1084_v26, %v594_v32 }
 0x143   : > { %704 = vmatmul.bf16.vlgmr.msra.gmra.mxu2 %v620_v33  ;;  %v616_v37 = vmax.f32 %v595_v35, 0.0 }
 0x144   : > { %v569_v34 = vpop.f32.mrf.mxu1 }
 0x145   : > { %v570_v39 = vadd.f32 %v1084_v26, %v569_v34 }
 0x147   : > { %v606_v44 = vmax.f32 %v570_v39, 0.0 }
 0x148   : > { %v596_v36 = vpop.f32.mrf.mxu3 }
 0x149   : > { %v597_v38 = vadd.f32 %v1084_v26, %v596_v36 }
 0x14b   : > { %v617_v40 = vmax.f32 %v597_v38, 0.0 }
 0x14c   : > { %v571_v41 = vpop.f32.mrf.mxu1 }
 0x14d   : > { %v572_v42 = vadd.f32 %v1084_v26, %v571_v41  ;;  %v626_v43 = vpack.c.bf16 %v617_v40, %v616_v37 }
 0x14f   : > { %v607_v45 = vmax.f32 %v572_v42, 0.0  ;;  %734 = vmatmul.bf16.vlgmr.msra.gmra.mxu3 %v626_v43 }
 0x150   : > { %v599_v46 = vpop.f32.mrf.mxu3 }
 0x151   : > { %v621_v47 = vpack.c.bf16 %v607_v45, %v606_v44  ;;  %v600_v49 = vadd.f32 %v1084_v26, %v599_v46 }
 0x153   : > { %709 = vmatmul.bf16.gmra.mxu2 %v621_v47  ;;  %v618_v51 = vmax.f32 %v600_v49, 0.0 }
 0x154   : > { %v574_v48 = vpop.f32.mrf.mxu1 }
 0x155   : > { %v575_v53 = vadd.f32 %v1084_v26, %v574_v48 }
 0x157   : > { %v608_v58 = vmax.f32 %v575_v53, 0.0 }
 0x158   : > { %v601_v50 = vpop.f32.mrf.mxu3 }
 0x159   : > { %v602_v52 = vadd.f32 %v1084_v26, %v601_v50 }
 0x15b   : > { %v619_v54 = vmax.f32 %v602_v52, 0.0 }
 0x15c   : > { %v576_v55 = vpop.f32.mrf.mxu1 }
 0x15d   : > { %v577_v56 = vadd.f32 %v1084_v26, %v576_v55  ;;  %v627_v57 = vpack.c.bf16 %v619_v54, %v618_v51 }
 0x15f   : > { %v609_v59 = vmax.f32 %v577_v56, 0.0  ;;  %739 = vmatmul.bf16.gmra.mxu3 %v627_v57 }
 0x161   : > { %v622_v60 = vpack.c.bf16 %v609_v59, %v608_v58 }
 0x163   : > { %714 = vmatmul.bf16.gmra.mxu2 %v622_v60 }
 0x164   : > { %v579_v61 = vpop.f32.mrf.mxu1 }
 0x165   : > { %v580_v62 = vadd.f32 %v1084_v26, %v579_v61 }
 0x167   : > { %v610_v1 = vmax.f32 %v580_v62, 0.0 }
 0x16c   : > { %v581_v63 = vpop.f32.mrf.mxu1 }
 0x16d   : > { %v582_v0 = vadd.f32 %v1084_v26, %v581_v63 }
 0x16f   : > { %v611_v2 = vmax.f32 %v582_v0, 0.0 }
 0x171   : > { %v623_v3 = vpack.c.bf16 %v611_v2, %v610_v1 }
 0x173   : > { %719 = vmatmul.bf16.gmra.mxu2 %v623_v3 }
 0x174   : > { %v584_v4 = vpop.f32.mrf.mxu1 }
 0x175   : > { %v585_v5 = vadd.f32 %v1084_v26, %v584_v4 }
 0x177   : > { %v612_v8 = vmax.f32 %v585_v5, 0.0 }
 0x17c   : > { %v586_v6 = vpop.f32.mrf.mxu1 }
 0x17d   : > { %v587_v7 = vadd.f32 %v1084_v26, %v586_v6 }
 0x17f   : > { %v613_v9 = vmax.f32 %v587_v7, 0.0 }
 0x181   : > { %v624_v10 = vpack.c.bf16 %v613_v9, %v612_v8 }
 0x183   : > { %724 = vmatmul.bf16.gmra.mxu2 %v624_v10 }
 0x184   : > { %v589_v11 = vpop.f32.mrf.mxu1 }
 0x185   : > { %v590_v12 = vadd.f32 %v1084_v26, %v589_v11 }
 0x187   : > { %v614_v15 = vmax.f32 %v590_v12, 0.0 }
 0x18c   : > { %v591_v13 = vpop.f32.mrf.mxu1 }
 0x18d   : > { %v592_v14 = vadd.f32 %v1084_v26, %v591_v13 }
 0x18f   : > { %v615_v16 = vmax.f32 %v592_v14, 0.0 }
 0x191   : > { %v625_v17 = vpack.c.bf16 %v615_v16, %v614_v15 }
 0x193   : > { %729 = vmatmul.bf16.gmra.mxu2 %v625_v17 }
 0x1c6   : > { %v705_v18 = vpop.f32.mrf.mxu2 }
 0x1c7   : > { %v706_v21 = vadd.f32 %v1085_v19, %v705_v18 }
 0x1ce   : > { %v707_v20 = vpop.f32.mrf.mxu2 }
 0x1cf   : > { %v708_v22 = vadd.f32 %v1085_v19, %v707_v20 }
 0x1d1   : > { %v1007_v23 = vpack.c.bf16 %v708_v22, %v706_v21 }
 0x1d2   : > { %v735_v24 = vpop.f32.mrf.mxu3 }
 0x1d3   : > { %1008 = vst [vmem:[%s1254_s25] sm:$0xff] %v1007_v23   ;;  %v736_v26 = vadd.f32 %v1085_v19, %v735_v24 }
 0x1d6   : > { %v710_v25 = vpop.f32.mrf.mxu2 }
 0x1d7   : > { %v711_v31 = vadd.f32 %v1085_v19, %v710_v25 }
 0x1da   : > { %v737_v27 = vpop.f32.mrf.mxu3 }
 0x1db   : > { %v738_v28 = vadd.f32 %v1085_v19, %v737_v27 }
 0x1dd   : > { %v1037_v29 = vpack.c.bf16 %v738_v28, %v736_v26 }
 0x1de   : > { %v712_v30 = vpop.f32.mrf.mxu2 }
 0x1df   : > { %v713_v32 = vadd.f32 %v1085_v19, %v712_v30  ;;  %1049 = vst [vmem:[%s1254_s25 + $0x30] sm:$0xff] %v1037_v29  }
 0x1e1   : > { %v1012_v33 = vpack.c.bf16 %v713_v32, %v711_v31 }
 0x1e2   : > { %v740_v34 = vpop.f32.mrf.mxu3 }
 0x1e3   : > { %1044 = vst [vmem:[%s1254_s25 + $0x8] sm:$0xff] %v1012_v33   ;;  %v741_v36 = vadd.f32 %v1085_v19, %v740_v34 }
 0x1e6   : > { %v715_v35 = vpop.f32.mrf.mxu2 }
 0x1e7   : > { %v716_v41 = vadd.f32 %v1085_v19, %v715_v35 }
 0x1ea   : > { %v742_v37 = vpop.f32.mrf.mxu3 }
 0x1eb   : > { %v743_v38 = vadd.f32 %v1085_v19, %v742_v37 }
 0x1ed   : > { %v1042_v39 = vpack.c.bf16 %v743_v38, %v741_v36 }
 0x1ee   : > { %v717_v40 = vpop.f32.mrf.mxu2 }
 0x1ef   : > { %v718_v42 = vadd.f32 %v1085_v19, %v717_v40  ;;  %1050 = vst [vmem:[%s1254_s25 + $0x38] sm:$0xff] %v1042_v39  }
 0x1f1   : > { %v1017_v43 = vpack.c.bf16 %v718_v42, %v716_v41 }
 0x1f3   : > { %1045 = vst [vmem:[%s1254_s25 + $0x10] sm:$0xff] %v1017_v43  }
 0x1f6   : > { %v720_v44 = vpop.f32.mrf.mxu2 }
 0x1f7   : > { %v721_v46 = vadd.f32 %v1085_v19, %v720_v44 }
 0x1fe   : > { %v722_v45 = vpop.f32.mrf.mxu2 }
 0x1ff   : > { %v723_v47 = vadd.f32 %v1085_v19, %v722_v45 }
 0x201   : > { %v1022_v48 = vpack.c.bf16 %v723_v47, %v721_v46 }
 0x203   : > { %1046 = vst [vmem:[%s1254_s25 + $0x18] sm:$0xff] %v1022_v48  }
 0x206   : > { %v725_v49 = vpop.f32.mrf.mxu2 }
 0x207   : > { %v726_v51 = vadd.f32 %v1085_v19, %v725_v49 }
 0x20e   : > { %v727_v50 = vpop.f32.mrf.mxu2 }
 0x20f   : > { %v728_v52 = vadd.f32 %v1085_v19, %v727_v50 }
 0x211   : > { %v1027_v53 = vpack.c.bf16 %v728_v52, %v726_v51 }
 0x213   : > { %1047 = vst [vmem:[%s1254_s25 + $0x20] sm:$0xff] %v1027_v53  }
 0x216   : > { %v730_v54 = vpop.f32.mrf.mxu2 }
 0x217   : > { %v731_v56 = vadd.f32 %v1085_v19, %v730_v54 }
 0x21e   : > { %v732_v55 = vpop.f32.mrf.mxu2 }
 0x21f   : > { %v733_v57 = vadd.f32 %v1085_v19, %v732_v55 }
 0x221   : > { %v1032_v58 = vpack.c.bf16 %v733_v57, %v731_v56 }
 0x223   : > { %1048 = vst [vmem:[%s1254_s25 + $0x28] sm:$0xff] %v1032_v58  }
 0x224 PF: > { %s17_s24 = sadd.s32 1, %s1092_s24  }
 0x225   : > { %p14_p4 = scmp.ge.s32.totalorder %s17_s24, 4  }
 0x227   :  { %16 = sbr.rel (!%p14_p4) target bundleno = 1 (0x1), region = 78 }

// kernel: _forward_impl.1
= control target key start
LH: loop header
LB: loop body
LE: loop exit
PB: predicated region body
PF: predicated region fallthrough
CT: control target
= control target key end

     0   :  { %s1134_s24 = smov 0   ;;  %s1267_s0 = inlined_call_operand.vmem [shape: bf16[256,128], index: 0, kind: input, shape index: {}]   ;;  %s1268_s1 = inlined_call_operand.vmem [shape: bf16[128,128], index: 1, kind: input, shape index: {}]   ;;  %s1269_s2 = inlined_call_operand.vmem [shape: f32[1,128], index: 2, kind: input, shape index: {}]   ;;  %s1270_s3 = inlined_call_operand.vmem [shape: bf16[128,128], index: 3, kind: input, shape index: {}]   ;;  %s1271_s4 = inlined_call_operand.vmem [shape: f32[1,128], index: 4, kind: input, shape index: {}]   ;;  %s1272_s5 = inlined_call_operand.vmem [shape: bf16[128,128], index: 5, kind: input, shape index: {}]   ;;  %s1273_s6 = inlined_call_operand.vmem [shape: f32[1,128], index: 6, kind: input, shape index: {}]   ;;  %s1274_s7 = inlined_call_operand.vmem [shape: bf16[256,128], index: 7, kind: output, shape index: {}]  }
   0x1 LB: > { %s833_s25 = sadd.s32 4294967295, %s1092_s24   ;;  %p837_p0 = scmp.ge.s32.totalorder %s1092_s24, 1  ;;  %s1092_s24 = sphi %s1134_s24, %s17_s24  }
   0x2   : > { %p238_p1 = scmp.lt.s32.totalorder %s1092_s24, 3 }
   0x4   : > { %p239_p2 = pnand %p837_p0, %p238_p1 }
   0x5   : > { %s838_s11 = sshll.u32 (!%p239_p2), %s833_s25, 4 }
   0x6   : > { %242 = sbr.rel (%p239_p2) target bundleno = 548 (0x224), region = 48  ;;  %p271_p3 = scmp.lt.s32.totalorder (!%p239_p2), %s838_s11, 31 }
   0xb   : > { %v987_v0 = vld [vmem:[%s1268_s1 + $0x38] sm:$0xff]  ;;  %v986_v1 = vld [vmem:[%s1268_s1 + $0x30] sm:$0xff]  ;;  %v985_v2 = vld [vmem:[%s1268_s1 + $0x28] sm:$0xff]  ;;  %s1276_s11 = smov (!%p271_p3, %s838_s11), 31 }
   0xc   : > { %414 = vmatpush.bf16.msra.mxu0 %v987_v0  ;;  %1051 = vmatpush.bf16.msra.mxu3 %v987_v0  ;;  %v984_v3 = vld [vmem:[%s1268_s1 + $0x20] sm:$0xff]  ;;  %v983_v4 = vld [vmem:[%s1268_s1 + $0x18] sm:$0xff]  ;;  %v982_v5 = vld [vmem:[%s1268_s1 + $0x10] sm:$0xff]  ;;  %s839_s18 = sshll.u32 %s1276_s11, 2 }
   0xd   : > { %v981_v6 = vld [vmem:[%s1268_s1 + $0x8] sm:$0xff]  ;;  %v980_v7 = vld [vmem:[%s1268_s1] sm:$0xff]  ;;  %s274_s23 = scalar_lea.vmem %s1267_s0, %s839_s18  ;;  %v995_v14 = vld [vmem:[%s1270_s3 + $0x38] sm:$0xff]  ;;  %s1254_s25 = scalar_lea.vmem %s1274_s7, %s839_s18 }
   0xe   : > { %v972_v8 = vld [vmem:[%s274_s23] sm:$0xff]  ;;  %v978_v9 = vld [vmem:[%s274_s23 + $0x30] sm:$0xff]  ;;  %v973_v10 = vld [vmem:[%s274_s23 + $0x8] sm:$0xff]  ;;  %555 = vmatpush.bf16.msra.mxu1 %v995_v14 }
   0xf   : > { %v979_v11 = vld [vmem:[%s274_s23 + $0x38] sm:$0xff]  ;;  %v974_v12 = vld [vmem:[%s274_s23 + $0x10] sm:$0xff]  ;;  %v993_v16 = vld [vmem:[%s1270_s3 + $0x28] sm:$0xff] }
  0x10   : > { %415 = vmatpush.bf16.msra.mxu0 %v986_v1  ;;  %1052 = vmatpush.bf16.msra.mxu3 %v986_v1  ;;  %v975_v13 = vld [vmem:[%s274_s23 + $0x18] sm:$0xff]  ;;  %v994_v15 = vld [vmem:[%s1270_s3 + $0x30] sm:$0xff]  ;;  %v992_v17 = vld [vmem:[%s1270_s3 + $0x20] sm:$0xff] }
  0x11   : > { %v976_v18 = vld [vmem:[%s274_s23 + $0x20] sm:$0xff]  ;;  %v977_v19 = vld [vmem:[%s274_s23 + $0x28] sm:$0xff]  ;;  %v991_v20 = vld [vmem:[%s1270_s3 + $0x18] sm:$0xff] }
  0x12   : > { %556 = vmatpush.bf16.msra.mxu1 %v994_v15  ;;  %v990_v21 = vld [vmem:[%s1270_s3 + $0x10] sm:$0xff]  ;;  %v989_v22 = vld [vmem:[%s1270_s3 + $0x8] sm:$0xff]  ;;  %v988_v23 = vld [vmem:[%s1270_s3] sm:$0xff] }
  0x13   : > { %v1201_v25 = vld [vmem:[%s1269_s2] ss:$0 sm:$0xff] }
  0x14   : > { %416 = vmatpush.bf16.msra.mxu0 %v985_v2  ;;  %1053 = vmatpush.bf16.msra.mxu3 %v985_v2 }
  0x16   : > { %557 = vmatpush.bf16.msra.mxu1 %v993_v16 }
  0x18   : > { %417 = vmatpush.bf16.msra.mxu0 %v984_v3  ;;  %1054 = vmatpush.bf16.msra.mxu3 %v984_v3  ;;  %v1003_v3 = vld [vmem:[%s1272_s5 + $0x38] sm:$0xff] }
  0x19   : > { %696 = vmatpush.bf16.msra.mxu2 %v1003_v3 }
  0x1a   : > { %558 = vmatpush.bf16.msra.mxu1 %v992_v17 }
  0x1c   : > { %418 = vmatpush.bf16.msra.mxu0 %v983_v4  ;;  %1055 = vmatpush.bf16.msra.mxu3 %v983_v4 }
  0x1e   : > { %559 = vmatpush.bf16.msra.mxu1 %v991_v20 }
  0x20   : > { %419 = vmatpush.bf16.msra.mxu0 %v982_v5  ;;  %1056 = vmatpush.bf16.msra.mxu3 %v982_v5  ;;  %v1002_v5 = vld [vmem:[%s1272_s5 + $0x30] sm:$0xff] }
  0x21   : > { %697 = vmatpush.bf16.msra.mxu2 %v1002_v5 }
  0x22   : > { %560 = vmatpush.bf16.msra.mxu1 %v990_v21 }
  0x24   : > { %420 = vmatpush.bf16.msra.mxu0 %v981_v6  ;;  %1057 = vmatpush.bf16.msra.mxu3 %v981_v6  ;;  %v1001_v6 = vld [vmem:[%s1272_s5 + $0x28] sm:$0xff] }
  0x25   : > { %698 = vmatpush.bf16.msra.mxu2 %v1001_v6 }
  0x26   : > { %561 = vmatpush.bf16.msra.mxu1 %v989_v22 }
  0x28   : > { %421 = vmatpush.bf16.msra.mxu0 %v980_v7  ;;  %1058 = vmatpush.bf16.msra.mxu3 %v980_v7 }
  0x2a   : > { %562 = vmatpush.bf16.msra.mxu1 %v988_v23 }
  0x2b   : > { %422 = vmatmul.bf16.vlgmr.msra.gmra.mxu0 %v972_v8  ;;  %452 = vmatmul.bf16.vlgmr.msra.gmra.mxu3 %v978_v9 }
  0x2c   : > { %1059 = vmatpush.bf16.msrb.mxu3 %v995_v14 }
  0x30   : > { %1060 = vmatpush.bf16.msrb.mxu3 %v994_v15 }
  0x34   : > { %1061 = vmatpush.bf16.msrb.mxu3 %v993_v16 }
  0x38   : > { %1062 = vmatpush.bf16.msrb.mxu3 %v992_v17 }
  0x3b   : > { %427 = vmatmul.bf16.gmra.mxu0 %v973_v10  ;;  %457 = vmatmul.bf16.gmra.mxu3 %v979_v11  ;;  %v1000_v10 = vld [vmem:[%s1272_s5 + $0x20] sm:$0xff] }
  0x3c   : > { %1063 = vmatpush.bf16.msrb.mxu3 %v991_v20  ;;  %699 = vmatpush.bf16.msra.mxu2 %v1000_v10 }
  0x40   : > { %1064 = vmatpush.bf16.msrb.mxu3 %v990_v21  ;;  %v999_v21 = vld [vmem:[%s1272_s5 + $0x18] sm:$0xff] }
  0x41   : > { %700 = vmatpush.bf16.msra.mxu2 %v999_v21 }
  0x44   : > { %1065 = vmatpush.bf16.msrb.mxu3 %v989_v22  ;;  %v998_v22 = vld [vmem:[%s1272_s5 + $0x10] sm:$0xff] }
  0x45   : > { %701 = vmatpush.bf16.msra.mxu2 %v998_v22 }
  0x48   : > { %1066 = vmatpush.bf16.msrb.mxu3 %v988_v23  ;;  %v997_v23 = vld [vmem:[%s1272_s5 + $0x8] sm:$0xff] }
  0x49   : > { %702 = vmatpush.bf16.msra.mxu2 %v997_v23 }
  0x4b   : > { %432 = vmatmul.bf16.gmra.mxu0 %v974_v12 }
  0x4c   : > { %1067 = vmatpush.bf16.msra.mxu3 %v1003_v3 }
  0x50   : > { %1068 = vmatpush.bf16.msra.mxu3 %v1002_v5 }
  0x54   : > { %1069 = vmatpush.bf16.msra.mxu3 %v1001_v6 }
  0x58   : > { %1070 = vmatpush.bf16.msra.mxu3 %v1000_v10 }
  0x5b   : > { %437 = vmatmul.bf16.gmra.mxu0 %v975_v13 }
  0x5c   : > { %1071 = vmatpush.bf16.msra.mxu3 %v999_v21 }
  0x60   : > { %1072 = vmatpush.bf16.msra.mxu3 %v998_v22 }
  0x64   : > { %1073 = vmatpush.bf16.msra.mxu3 %v997_v23 }
  0x6b   : > { %442 = vmatmul.bf16.gmra.mxu0 %v976_v18 }
  0x7b   : > { %447 = vmatmul.bf16.gmra.mxu0 %v977_v19 }
  0xa8   : > { %v423_v24 = vpop.f32.mrf.mxu0 }
  0xa9   : > { %v424_v27 = vadd.f32 %v1201_v25, %v423_v24  ;;  %v996_v24 = vld [vmem:[%s1272_s5] sm:$0xff] }
  0xaa   : > { %703 = vmatpush.bf16.msra.mxu2 %v996_v24  ;;  %1074 = vmatpush.bf16.msra.mxu3 %v996_v24 }
  0xab   : > { %v463_v30 = vmax.f32 %v424_v27, 0.0 }
  0xae   : > { %v453_v26 = vpop.f32.mrf.mxu3 }
  0xaf   : > { %v454_v32 = vadd.f32 %v1201_v25, %v453_v26  ;;  %v1084_v26 = vld [vmem:[%s1271_s4] ss:$0 sm:$0xff] }
  0xb0   : > { %v425_v28 = vpop.f32.mrf.mxu0 }
  0xb1   : > { %v426_v29 = vadd.f32 %v1201_v25, %v425_v28  ;;  %v475_v35 = vmax.f32 %v454_v32, 0.0 }
  0xb3   : > { %v464_v31 = vmax.f32 %v426_v29, 0.0 }
  0xb5   : > { %v479_v33 = vpack.c.bf16 %v464_v31, %v463_v30 }
  0xb6   : > { %v455_v34 = vpop.f32.mrf.mxu3 }
  0xb7   : > { %563 = vmatmul.bf16.vlgmr.msra.gmra.mxu1 %v479_v33  ;;  %v456_v36 = vadd.f32 %v1201_v25, %v455_v34 }
  0xb8   : > { %v428_v37 = vpop.f32.mrf.mxu0 }
  0xb9   : > { %v476_v38 = vmax.f32 %v456_v36, 0.0  ;;  %v429_v41 = vadd.f32 %v1201_v25, %v428_v37 }
  0xbb   : > { %v485_v39 = vpack.c.bf16 %v476_v38, %v475_v35  ;;  %v465_v44 = vmax.f32 %v429_v41, 0.0 }
  0xbd   : > { %593 = vmatmul.bf16.vlgmr.msrb.gmra.mxu3 %v485_v39 }
  0xbe   : > { %v458_v40 = vpop.f32.mrf.mxu3 }
  0xbf   : > { %v459_v46 = vadd.f32 %v1201_v25, %v458_v40 }
  0xc0   : > { %v430_v42 = vpop.f32.mrf.mxu0 }
  0xc1   : > { %v431_v43 = vadd.f32 %v1201_v25, %v430_v42  ;;  %v477_v49 = vmax.f32 %v459_v46, 0.0 }
  0xc3   : > { %v466_v45 = vmax.f32 %v431_v43, 0.0 }
  0xc5   : > { %v480_v47 = vpack.c.bf16 %v466_v45, %v465_v44 }
  0xc6   : > { %v460_v48 = vpop.f32.mrf.mxu3 }
  0xc7   : > { %568 = vmatmul.bf16.gmra.mxu1 %v480_v47  ;;  %v461_v50 = vadd.f32 %v1201_v25, %v460_v48 }
  0xc8   : > { %v433_v51 = vpop.f32.mrf.mxu0 }
  0xc9   : > { %v478_v52 = vmax.f32 %v461_v50, 0.0  ;;  %v434_v54 = vadd.f32 %v1201_v25, %v433_v51 }
  0xcb   : > { %v486_v53 = vpack.c.bf16 %v478_v52, %v477_v49  ;;  %v467_v57 = vmax.f32 %v434_v54, 0.0 }
  0xcd   : > { %598 = vmatmul.bf16.gmra.mxu3 %v486_v53 }
  0xd0   : > { %v435_v55 = vpop.f32.mrf.mxu0 }
  0xd1   : > { %v436_v56 = vadd.f32 %v1201_v25, %v435_v55 }
  0xd3   : > { %v468_v58 = vmax.f32 %v436_v56, 0.0 }
  0xd5   : > { %v481_v59 = vpack.c.bf16 %v468_v58, %v467_v57 }
  0xd7   : > { %573 = vmatmul.bf16.gmra.mxu1 %v481_v59 }
  0xd8   : > { %v438_v60 = vpop.f32.mrf.mxu0 }
  0xd9   : > { %v439_v61 = vadd.f32 %v1201_v25, %v438_v60 }
  0xdb   : > { %v469_v0 = vmax.f32 %v439_v61, 0.0 }
  0xe0   : > { %v440_v62 = vpop.f32.mrf.mxu0 }
  0xe1   : > { %v441_v63 = vadd.f32 %v1201_v25, %v440_v62 }
  0xe3   : > { %v470_v1 = vmax.f32 %v441_v63, 0.0 }
  0xe5   : > { %v482_v2 = vpack.c.bf16 %v470_v1, %v469_v0 }
  0xe7   : > { %578 = vmatmul.bf16.gmra.mxu1 %v482_v2 }
  0xe8   : > { %v443_v4 = vpop.f32.mrf.mxu0 }
  0xe9   : > { %v444_v7 = vadd.f32 %v1201_v25, %v443_v4 }
  0xeb   : > { %v471_v11 = vmax.f32 %v444_v7, 0.0 }
  0xf0   : > { %v445_v8 = vpop.f32.mrf.mxu0 }
  0xf1   : > { %v446_v9 = vadd.f32 %v1201_v25, %v445_v8 }
  0xf3   : > { %v472_v12 = vmax.f32 %v446_v9, 0.0 }
  0xf5   : > { %v483_v13 = vpack.c.bf16 %v472_v12, %v471_v11 }
  0xf7   : > { %583 = vmatmul.bf16.gmra.mxu1 %v483_v13 }
  0xf8   : > { %v448_v14 = vpop.f32.mrf.mxu0 }
  0xf9   : > { %v449_v15 = vadd.f32 %v1201_v25, %v448_v14 }
  0xfb   : > { %v473_v18 = vmax.f32 %v449_v15, 0.0 }
 0x100   : > { %v450_v16 = vpop.f32.mrf.mxu0 }
 0x101   : > { %v451_v17 = vadd.f32 %v1201_v25, %v450_v16 }
 0x103   : > { %v474_v19 = vmax.f32 %v451_v17, 0.0 }
 0x105   : > { %v484_v20 = vpack.c.bf16 %v474_v19, %v473_v18  ;;  %v1085_v19 = vld [vmem:[%s1273_s6] ss:$0 sm:$0xff] }
 0x107   : > { %588 = vmatmul.bf16.gmra.mxu1 %v484_v20 }
 0x134   : > { %v564_v25 = vpop.f32.mrf.mxu1 }
 0x135   : > { %v565_v27 = vadd.f32 %v1084_v26, %v564_v25 }
 0x137   : > { %v604_v30 = vmax.f32 %v565_v27, 0.0 }
 0x13c   : > { %v566_v28 = vpop.f32.mrf.mxu1 }
 0x13d   : > { %v567_v29 = vadd.f32 %v1084_v26, %v566_v28 }
 0x13f   : > { %v605_v31 = vmax.f32 %v567_v29, 0.0 }
 0x140   : > { %v594_v32 = vpop.f32.mrf.mxu3 }
 0x141   : > { %v620_v33 = vpack.c.bf16 %v605_v31, %v604_v30  ;;  %v595_v35 = vadd.f32 %v1084_v26, %v594_v32 }
 0x143   : > { %704 = vmatmul.bf16.vlgmr.msra.gmra.mxu2 %v620_v33  ;;  %v616_v37 = vmax.f32 %v595_v35, 0.0 }
 0x144   : > { %v569_v34 = vpop.f32.mrf.mxu1 }
 0x145   : > { %v570_v39 = vadd.f32 %v1084_v26, %v569_v34 }
 0x147   : > { %v606_v44 = vmax.f32 %v570_v39, 0.0 }
 0x148   : > { %v596_v36 = vpop.f32.mrf.mxu3 }
 0x149   : > { %v597_v38 = vadd.f32 %v1084_v26, %v596_v36 }
 0x14b   : > { %v617_v40 = vmax.f32 %v597_v38, 0.0 }
 0x14c   : > { %v571_v41 = vpop.f32.mrf.mxu1 }
 0x14d   : > { %v572_v42 = vadd.f32 %v1084_v26, %v571_v41  ;;  %v626_v43 = vpack.c.bf16 %v617_v40, %v616_v37 }
 0x14f   : > { %v607_v45 = vmax.f32 %v572_v42, 0.0  ;;  %734 = vmatmul.bf16.vlgmr.msra.gmra.mxu3 %v626_v43 }
 0x150   : > { %v599_v46 = vpop.f32.mrf.mxu3 }
 0x151   : > { %v621_v47 = vpack.c.bf16 %v607_v45, %v606_v44  ;;  %v600_v49 = vadd.f32 %v1084_v26, %v599_v46 }
 0x153   : > { %709 = vmatmul.bf16.gmra.mxu2 %v621_v47  ;;  %v618_v51 = vmax.f32 %v600_v49, 0.0 }
 0x154   : > { %v574_v48 = vpop.f32.mrf.mxu1 }
 0x155   : > { %v575_v53 = vadd.f32 %v1084_v26, %v574_v48 }
 0x157   : > { %v608_v58 = vmax.f32 %v575_v53, 0.0 }
 0x158   : > { %v601_v50 = vpop.f32.mrf.mxu3 }
 0x159   : > { %v602_v52 = vadd.f32 %v1084_v26, %v601_v50 }
 0x15b   : > { %v619_v54 = vmax.f32 %v602_v52, 0.0 }
 0x15c   : > { %v576_v55 = vpop.f32.mrf.mxu1 }
 0x15d   : > { %v577_v56 = vadd.f32 %v1084_v26, %v576_v55  ;;  %v627_v57 = vpack.c.bf16 %v619_v54, %v618_v51 }
 0x15f   : > { %v609_v59 = vmax.f32 %v577_v56, 0.0  ;;  %739 = vmatmul.bf16.gmra.mxu3 %v627_v57 }
 0x161   : > { %v622_v60 = vpack.c.bf16 %v609_v59, %v608_v58 }
 0x163   : > { %714 = vmatmul.bf16.gmra.mxu2 %v622_v60 }
 0x164   : > { %v579_v61 = vpop.f32.mrf.mxu1 }
 0x165   : > { %v580_v62 = vadd.f32 %v1084_v26, %v579_v61 }
 0x167   : > { %v610_v1 = vmax.f32 %v580_v62, 0.0 }
 0x16c   : > { %v581_v63 = vpop.f32.mrf.mxu1 }
 0x16d   : > { %v582_v0 = vadd.f32 %v1084_v26, %v581_v63 }
 0x16f   : > { %v611_v2 = vmax.f32 %v582_v0, 0.0 }
 0x171   : > { %v623_v3 = vpack.c.bf16 %v611_v2, %v610_v1 }
 0x173   : > { %719 = vmatmul.bf16.gmra.mxu2 %v623_v3 }
 0x174   : > { %v584_v4 = vpop.f32.mrf.mxu1 }
 0x175   : > { %v585_v5 = vadd.f32 %v1084_v26, %v584_v4 }
 0x177   : > { %v612_v8 = vmax.f32 %v585_v5, 0.0 }
 0x17c   : > { %v586_v6 = vpop.f32.mrf.mxu1 }
 0x17d   : > { %v587_v7 = vadd.f32 %v1084_v26, %v586_v6 }
 0x17f   : > { %v613_v9 = vmax.f32 %v587_v7, 0.0 }
 0x181   : > { %v624_v10 = vpack.c.bf16 %v613_v9, %v612_v8 }
 0x183   : > { %724 = vmatmul.bf16.gmra.mxu2 %v624_v10 }
 0x184   : > { %v589_v11 = vpop.f32.mrf.mxu1 }
 0x185   : > { %v590_v12 = vadd.f32 %v1084_v26, %v589_v11 }
 0x187   : > { %v614_v15 = vmax.f32 %v590_v12, 0.0 }
 0x18c   : > { %v591_v13 = vpop.f32.mrf.mxu1 }
 0x18d   : > { %v592_v14 = vadd.f32 %v1084_v26, %v591_v13 }
 0x18f   : > { %v615_v16 = vmax.f32 %v592_v14, 0.0 }
 0x191   : > { %v625_v17 = vpack.c.bf16 %v615_v16, %v614_v15 }
 0x193   : > { %729 = vmatmul.bf16.gmra.mxu2 %v625_v17 }
 0x1c6   : > { %v705_v18 = vpop.f32.mrf.mxu2 }
 0x1c7   : > { %v706_v21 = vadd.f32 %v1085_v19, %v705_v18 }
 0x1ce   : > { %v707_v20 = vpop.f32.mrf.mxu2 }
 0x1cf   : > { %v708_v22 = vadd.f32 %v1085_v19, %v707_v20 }
 0x1d1   : > { %v1007_v23 = vpack.c.bf16 %v708_v22, %v706_v21 }
 0x1d2   : > { %v735_v24 = vpop.f32.mrf.mxu3 }
 0x1d3   : > { %1008 = vst [vmem:[%s1254_s25] sm:$0xff] %v1007_v23   ;;  %v736_v26 = vadd.f32 %v1085_v19, %v735_v24 }
 0x1d6   : > { %v710_v25 = vpop.f32.mrf.mxu2 }
 0x1d7   : > { %v711_v31 = vadd.f32 %v1085_v19, %v710_v25 }
 0x1da   : > { %v737_v27 = vpop.f32.mrf.mxu3 }
 0x1db   : > { %v738_v28 = vadd.f32 %v1085_v19, %v737_v27 }
 0x1dd   : > { %v1037_v29 = vpack.c.bf16 %v738_v28, %v736_v26 }
 0x1de   : > { %v712_v30 = vpop.f32.mrf.mxu2 }
 0x1df   : > { %v713_v32 = vadd.f32 %v1085_v19, %v712_v30  ;;  %1049 = vst [vmem:[%s1254_s25 + $0x30] sm:$0xff] %v1037_v29  }
 0x1e1   : > { %v1012_v33 = vpack.c.bf16 %v713_v32, %v711_v31 }
 0x1e2   : > { %v740_v34 = vpop.f32.mrf.mxu3 }
 0x1e3   : > { %1044 = vst [vmem:[%s1254_s25 + $0x8] sm:$0xff] %v1012_v33   ;;  %v741_v36 = vadd.f32 %v1085_v19, %v740_v34 }
 0x1e6   : > { %v715_v35 = vpop.f32.mrf.mxu2 }
 0x1e7   : > { %v716_v41 = vadd.f32 %v1085_v19, %v715_v35 }
 0x1ea   : > { %v742_v37 = vpop.f32.mrf.mxu3 }
 0x1eb   : > { %v743_v38 = vadd.f32 %v1085_v19, %v742_v37 }
 0x1ed   : > { %v1042_v39 = vpack.c.bf16 %v743_v38, %v741_v36 }
 0x1ee   : > { %v717_v40 = vpop.f32.mrf.mxu2 }
 0x1ef   : > { %v718_v42 = vadd.f32 %v1085_v19, %v717_v40  ;;  %1050 = vst [vmem:[%s1254_s25 + $0x38] sm:$0xff] %v1042_v39  }
 0x1f1   : > { %v1017_v43 = vpack.c.bf16 %v718_v42, %v716_v41 }
 0x1f3   : > { %1045 = vst [vmem:[%s1254_s25 + $0x10] sm:$0xff] %v1017_v43  }
 0x1f6   : > { %v720_v44 = vpop.f32.mrf.mxu2 }
 0x1f7   : > { %v721_v46 = vadd.f32 %v1085_v19, %v720_v44 }
 0x1fe   : > { %v722_v45 = vpop.f32.mrf.mxu2 }
 0x1ff   : > { %v723_v47 = vadd.f32 %v1085_v19, %v722_v45 }
 0x201   : > { %v1022_v48 = vpack.c.bf16 %v723_v47, %v721_v46 }
 0x203   : > { %1046 = vst [vmem:[%s1254_s25 + $0x18] sm:$0xff] %v1022_v48  }
 0x206   : > { %v725_v49 = vpop.f32.mrf.mxu2 }
 0x207   : > { %v726_v51 = vadd.f32 %v1085_v19, %v725_v49 }
 0x20e   : > { %v727_v50 = vpop.f32.mrf.mxu2 }
 0x20f   : > { %v728_v52 = vadd.f32 %v1085_v19, %v727_v50 }
 0x211   : > { %v1027_v53 = vpack.c.bf16 %v728_v52, %v726_v51 }
 0x213   : > { %1047 = vst [vmem:[%s1254_s25 + $0x20] sm:$0xff] %v1027_v53  }
 0x216   : > { %v730_v54 = vpop.f32.mrf.mxu2 }
 0x217   : > { %v731_v56 = vadd.f32 %v1085_v19, %v730_v54 }
 0x21e   : > { %v732_v55 = vpop.f32.mrf.mxu2 }
 0x21f   : > { %v733_v57 = vadd.f32 %v1085_v19, %v732_v55 }
 0x221   : > { %v1032_v58 = vpack.c.bf16 %v733_v57, %v731_v56 }
 0x223   : > { %1048 = vst [vmem:[%s1254_s25 + $0x28] sm:$0xff] %v1032_v58  }
 0x224 PF: > { %s17_s24 = sadd.s32 1, %s1092_s24  }
 0x225   : > { %p14_p4 = scmp.ge.s32.totalorder %s17_s24, 4  }
 0x227   :  { %16 = sbr.rel (!%p14_p4) target bundleno = 1 (0x1), region = 78 }

</bundles_post_ra>
